<compile_context>
chip_gen: v7x
topology: tpu7x:2x2x1
jax: 0.10.0
libtpu: 0.0.40
codegen_flags: <defaults>
</compile_context>

<pallas_src>
import functools

import jax
import jax.numpy as jnp
from jax.experimental import pallas as pl
from jax.experimental.pallas import tpu as pltpu

_EPS = 1e-6  # torch F.pairwise_distance adds eps to the difference before the norm


def _contrastive_kernel(z1_ref, z2_ref, label_ref, acc_ref, *, margin, valid_b, tb, masked):
    """Accumulates lane-dense per-row contributions into the resident (1, tb) output."""
    i = pl.program_id(0)

    @pl.when(i == 0)
    def _():
        acc_ref[...] = jnp.zeros_like(acc_ref)

    # Feature-major (D, tb) tiles: batch on the 128-lane axis, reduce over sublanes.
    diff = z1_ref[...].astype(jnp.float32) - z2_ref[...].astype(jnp.float32) + _EPS
    sq = jnp.sum(diff * diff, axis=0, keepdims=True)        # (1, tb) squared L2 per row
    d = jnp.sqrt(sq)                                         # (1, tb) euclidean distance

    lab = label_ref[...].astype(jnp.float32)                 # (1, tb), lane-dense
    hinge = jnp.maximum(margin - d, 0.0)
    per_row = (1.0 - lab) * sq + lab * hinge * hinge         # (1, tb)

    if masked:
        # Zero out padded tail rows (global column index >= true batch size).
        col = i * tb + jax.lax.broadcasted_iota(jnp.int32, (1, tb), 1)
        per_row = jnp.where(col < valid_b, per_row, 0.0)

    acc_ref[...] += per_row


def contrastive_loss(z1, z2, label, *, margin=1.0, tb=None):
    """Pallas TPU contrastive loss.  z1, z2: (B, D); label: (B,) or (B, 1)."""
    B, D = z1.shape
    assert z2.shape == (B, D)
    dtype_bytes = jnp.dtype(z1.dtype).itemsize

    try:
        vmem_cap = int(pltpu.get_tpu_info().vmem_capacity_bytes)
    except Exception:  # conservative fallback (v7x per-TC VMEM)
        vmem_cap = 64 * 1024 * 1024

    if tb is None:
        # Double-buffered pipeline: 2 feature tiles x 2 buffers per batch column,
        # plus the (tiny) label stream and f32 accumulator row.
        budget = int(vmem_cap * 0.55)
        bytes_per_col = 4 * D * dtype_bytes + 2 * 4 + 4
        tb_cap = max(128, budget // bytes_per_col)
        if B <= tb_cap:
            tb = B                                  # whole batch in one lane-dense tile
        else:
            tb = min((tb_cap // 128) * 128, 4096)   # multiple of 128 for the lane axis

    n_tiles = -(-B // tb)
    Bp = n_tiles * tb
    masked = Bp != B

    # Feature-major layout: rows on the lane axis (lane-dense per-row math, contiguous
    # label DMA).  Inputs keep their native dtype; the kernel casts to f32 after the load.
    z1t = jnp.transpose(z1)                          # (D, B)
    z2t = jnp.transpose(z2)
    lab = jnp.reshape(label, (1, B)).astype(jnp.float32)
    if masked:
        pad = Bp - B
        z1t = jnp.pad(z1t, ((0, 0), (0, pad)))
        z2t = jnp.pad(z2t, ((0, 0), (0, pad)))
        lab = jnp.pad(lab, ((0, 0), (0, pad)))

    # Explicit scoped-VMEM limit so large tiles are not rejected at the default limit.
    vmem_need = 4 * D * tb * dtype_bytes + 4 * tb * 4 + tb * 4 + (2 << 20)
    vmem_limit = min(max(vmem_need, 32 * 1024 * 1024), int(vmem_cap * 0.9))

    kernel = functools.partial(
        _contrastive_kernel, margin=float(margin), valid_b=B, tb=tb, masked=masked
    )

    partials = pl.pallas_call(
        kernel,
        out_shape=jax.ShapeDtypeStruct((1, tb), jnp.float32),
        grid_spec=pltpu.PrefetchScalarGridSpec(
            num_scalar_prefetch=0,
            grid=(n_tiles,),
            in_specs=[
                pl.BlockSpec((D, tb), lambda i: (0, i)),
                pl.BlockSpec((D, tb), lambda i: (0, i)),
                pl.BlockSpec((1, tb), lambda i: (0, i)),
            ],
            out_specs=pl.BlockSpec((1, tb), lambda i: (0, 0)),
        ),
        compiler_params=pltpu.CompilerParams(
            dimension_semantics=("arbitrary",),      # batch axis reduces into the output
            vmem_limit_bytes=int(vmem_limit),
        ),
    )(z1t, z2t, lab)

    # TODO(synk): on v7x, shard the batch grid across the 2 TensorCores (CORE_PARALLEL
    # leading axis + per-core partial-sum rows) for ~2x; v5e/v6e have a single TC.
    return jnp.sum(partials) / B


def _reference(z1, z2, label, margin=1.0):
    d = jnp.sqrt(jnp.sum((z1 - z2 + _EPS) ** 2, axis=-1))
    return jnp.mean((1.0 - label) * d ** 2 + label * jnp.maximum(margin - d, 0.0) ** 2)


if __name__ == "__main__":
    key = jax.random.PRNGKey(0)
    k1, k2, k3 = jax.random.split(key, 3)

    # Small single-tile case (B <= tile cap -> one lane-dense (D, B) tile).
    B, D = 16, 32
    z1 = jax.random.normal(k1, (B, D), dtype=jnp.float32)
    z2 = jax.random.normal(k2, (B, D), dtype=jnp.float32)
    label = jax.random.bernoulli(k3, 0.5, (B,)).astype(jnp.float32)

    loss = contrastive_loss(z1, z2, label, margin=1.0)
    jax.block_until_ready(loss)
    ref = _reference(z1, z2, label, margin=1.0)
    assert jnp.allclose(loss, ref, rtol=1e-5, atol=1e-5), (loss, ref)

    # Non-divisible batch with explicit small tile -> exercises the padded/masked tail path.
    B2 = 200
    z1b = jax.random.normal(k1, (B2, D), dtype=jnp.float32)
    z2b = jax.random.normal(k2, (B2, D), dtype=jnp.float32)
    labelb = jax.random.bernoulli(k3, 0.5, (B2,)).astype(jnp.float32)

    loss2 = contrastive_loss(z1b, z2b, labelb, margin=1.0, tb=128)
    jax.block_until_ready(loss2)
    ref2 = _reference(z1b, z2b, labelb, margin=1.0)
    assert jnp.allclose(loss2, ref2, rtol=1e-5, atol=1e-5), (loss2, ref2)

    print("KERNEL_OK")
</pallas_src>

<mosaic_0001>
module attributes {stable_mosaic.version = 11 : i64} {
  func.func @_contrastive_kernel(%arg0: i32, %arg1: memref<32x16xf32, #tpu.memory_space<vmem>>, %arg2: memref<32x16xf32, #tpu.memory_space<vmem>>, %arg3: memref<1x16xf32, #tpu.memory_space<vmem>>, %arg4: memref<1x16xf32, #tpu.memory_space<vmem>>) attributes {dimension_semantics = [#tpu.dimension_semantics<arbitrary>], iteration_bounds = array<i64: 1>, scalar_prefetch = 0 : i64, scratch_operands = 0 : i64, tpu.core_type = #tpu.core_type<tc>, window_params = [{transform_indices = @transform_0, window_bounds = array<i64: 32, 16>}, {transform_indices = @transform_1, window_bounds = array<i64: 32, 16>}, {transform_indices = @transform_2, window_bounds = array<i64: 1, 16>}, {pipeline_mode = #tpu.pipeline_mode<synchronous>, transform_indices = @transform_3, window_bounds = array<i64: 1, 16>}]} {
    %c0_i32 = arith.constant 0 : i32
    %0 = arith.cmpi eq, %arg0, %c0_i32 : i32
    %1 = arith.extui %0 : i1 to i32
    %c0_i32_0 = arith.constant 0 : i32
    %2 = arith.cmpi ne, %1, %c0_i32_0 : i32
    scf.if %2 {
      %cst_14 = arith.constant 0.000000e+00 : f32
      %26 = vector.broadcast %cst_14 : f32 to vector<1x16xf32>
      %c0_15 = arith.constant 0 : index
      %c0_16 = arith.constant 0 : index
      %27 = vector.load %arg4[%c0_15, %c0_16] : memref<1x16xf32, #tpu.memory_space<vmem>>, vector<1x16xf32>
      tpu.vector_store %arg4[%c0_15, %c0_16], %26 {strides = array<i32>} : memref<1x16xf32, #tpu.memory_space<vmem>>, vector<1x16xf32>,
    } else {
    }
    %c0 = arith.constant 0 : index
    %c0_1 = arith.constant 0 : index
    %3 = vector.load %arg1[%c0, %c0_1] : memref<32x16xf32, #tpu.memory_space<vmem>>, vector<32x16xf32>
    %c0_2 = arith.constant 0 : index
    %c0_3 = arith.constant 0 : index
    %4 = vector.load %arg2[%c0_2, %c0_3] : memref<32x16xf32, #tpu.memory_space<vmem>>, vector<32x16xf32>
    %5 = arith.subf %3, %4 : vector<32x16xf32>
    %cst = arith.constant 9.99999997E-7 : f32
    %6 = vector.broadcast %cst : f32 to vector<32x16xf32>
    %7 = arith.addf %5, %6 : vector<32x16xf32>
    %8 = arith.mulf %7, %7 : vector<32x16xf32>
    %cst_4 = arith.constant dense<0.000000e+00> : vector<16xf32>
    %9 = vector.multi_reduction <add>, %8, %cst_4 [0] : vector<32x16xf32> to vector<16xf32>
    %10 = vector.shape_cast %9 : vector<16xf32> to vector<1x16xf32>
    %11 = math.sqrt %10 : vector<1x16xf32>
    %c0_5 = arith.constant 0 : index
    %c0_6 = arith.constant 0 : index
    %12 = vector.load %arg3[%c0_5, %c0_6] : memref<1x16xf32, #tpu.memory_space<vmem>>, vector<1x16xf32>
    %cst_7 = arith.constant 1.000000e+00 : f32
    %13 = vector.broadcast %cst_7 : f32 to vector<1x16xf32>
    %14 = arith.subf %13, %11 : vector<1x16xf32>
    %cst_8 = arith.constant 0.000000e+00 : f32
    %15 = vector.broadcast %cst_8 : f32 to vector<1x16xf32>
    %16 = arith.maximumf %14, %15 : vector<1x16xf32>
    %cst_9 = arith.constant 1.000000e+00 : f32
    %17 = vector.broadcast %cst_9 : f32 to vector<1x16xf32>
    %18 = arith.subf %17, %12 : vector<1x16xf32>
    %19 = arith.mulf %18, %10 : vector<1x16xf32>
    %20 = arith.mulf %12, %16 : vector<1x16xf32>
    %21 = arith.mulf %20, %16 : vector<1x16xf32>
    %22 = arith.addf %19, %21 : vector<1x16xf32>
    %c0_10 = arith.constant 0 : index
    %c0_11 = arith.constant 0 : index
    %23 = vector.load %arg4[%c0_10, %c0_11] : memref<1x16xf32, #tpu.memory_space<vmem>>, vector<1x16xf32>
    %24 = arith.addf %23, %22 : vector<1x16xf32>
    %c0_12 = arith.constant 0 : index
    %c0_13 = arith.constant 0 : index
    %25 = vector.load %arg4[%c0_12, %c0_13] : memref<1x16xf32, #tpu.memory_space<vmem>>, vector<1x16xf32>
    tpu.vector_store %arg4[%c0_12, %c0_13], %24 {strides = array<i32>} : memref<1x16xf32, #tpu.memory_space<vmem>>, vector<1x16xf32>,
    return
  }
  func.func @transform_0(%arg0: i32) -> (i32, i32) {
    %c0_i32 = arith.constant 0 : i32
    %c0_i32_0 = arith.constant 0 : i32
    return %c0_i32, %arg0 : i32, i32
  }
  func.func @transform_1(%arg0: i32) -> (i32, i32) {
    %c0_i32 = arith.constant 0 : i32
    %c0_i32_0 = arith.constant 0 : i32
    return %c0_i32, %arg0 : i32, i32
  }
  func.func @transform_2(%arg0: i32) -> (i32, i32) {
    %c0_i32 = arith.constant 0 : i32
    %c0_i32_0 = arith.constant 0 : i32
    return %c0_i32, %arg0 : i32, i32
  }
  func.func @transform_3(%arg0: i32) -> (i32, i32) {
    %c0_i32 = arith.constant 0 : i32
    %c0_i32_0 = arith.constant 0 : i32
    %c0_i32_1 = arith.constant 0 : i32
    return %c0_i32, %c0_i32_0 : i32, i32
  }
}

</mosaic_0001>

<bundles_post_ra>
// kernel: tpu_custom_call.1
= control target key start
LH: loop header
LB: loop body
LE: loop exit
PB: predicated region body
PF: predicated region fallthrough
CT: control target
= control target key end

     0   :  { %vm19_vm0 = vcmask 122880   ;;  %v116_v3 = vmov 0.0   ;;  %s179_s0 = inlined_call_operand.vmem [shape: f32[32,16], index: 0, kind: input, shape index: {}]   ;;  %s180_s1 = inlined_call_operand.vmem [shape: f32[32,16], index: 1, kind: input, shape index: {}]   ;;  %s181_s2 = inlined_call_operand.vmem [shape: f32[1,16], index: 2, kind: input, shape index: {}]   ;;  %s182_s3 = inlined_call_operand.hbm [shape: f32[1,16], index: 3, kind: output, shape index: {}]  }
   0x1   :  { %v21_v0 = vld [vmem:[%s179_s0] sm:$0xff]  ;;  %v22_v1 = vld [vmem:[%s179_s0 + $0x8] sm:$0xff]  ;;  %v23_v2 = vld [vmem:[%s179_s0 + $0x10] sm:$0xff]  ;;  %20 = vst.msk [vmem:[#allocation2] sm:$0x1] %vm19_vm0, %v116_v3 }
   0x2   :  { %v24_v4 = vld [vmem:[%s179_s0 + $0x18] sm:$0xff]  ;;  %v25_v5 = vld [vmem:[%s180_s1] sm:$0xff]  ;;  %v26_v6 = vld [vmem:[%s180_s1 + $0x8] sm:$0xff] }
   0x3   :  { %v27_v7 = vld [vmem:[%s180_s1 + $0x10] sm:$0xff]  ;;  %v28_v8 = vld [vmem:[%s180_s1 + $0x18] sm:$0xff]  ;;  %v29_v9 = vsub.f32 %v21_v0, %v25_v5  ;;  %v30_v10 = vsub.f32 %v22_v1, %v26_v6 }
   0x4   :  { %v31_v11 = vsub.f32 %v23_v2, %v27_v7  ;;  %v32_v12 = vsub.f32 %v24_v4, %v28_v8 }
   0x5   :  { %8 = vsyncpa [#allocation3], 0  ;;  %v33_v13 = vadd.f32 1e-06, %v29_v9  ;;  %v34_v14 = vadd.f32 1e-06, %v30_v10 }
   0x6   :  { %v35_v15 = vadd.f32 1e-06, %v31_v11  ;;  %v36_v16 = vadd.f32 1e-06, %v32_v12  ;;  %vm41_vm1 = vcmask 130048   ;;  %s117_s28 = smov [#allocation2]  }
   0x7   :  { %v37_v17 = vmul.f32 %v33_v13, %v33_v13  ;;  %v38_v18 = vmul.f32 %v34_v14, %v34_v14  ;;  %v62_v37 = vld [vmem:[%s181_s2] sm:$0x1]  ;;  %s80_s29 = sshll.u32 %s117_s28, 4  ;;  %s81_s29 = int_to_ptr.vmem [resolvable:$true] %s80_s29 }
   0x8   :  { %v39_v19 = vmul.f32 %v35_v15, %v35_v15  ;;  %v40_v20 = vmul.f32 %v36_v16, %v36_v16  ;;  %v65_v41 = vsub.f32 1.0, %v62_v37  ;;  %v70_v46 = vld [vmem:[#allocation2] sm:$0x1]  ;;  %s92_s30 = scalar_lea.vmem %s81_s29, 16  ;;  %s96_s4 = scalar_lea.vmem %s81_s29, 32 }
   0x9   :  { %v42_v21 = vsel %vm41_vm1, %v37_v17, 0.0  ;;  %v43_v22 = vsel %vm41_vm1, %v38_v18, 0.0  ;;  %p93_p0 = scmp.ne.s32.totalorder %s81_s29, %s92_s30  ;;  %p97_p1 = scmp.lt.s32.totalorder %s81_s29, %s81_s29 }
   0xa   :  { %v44_v23 = vadd.f32 %v43_v22, %v42_v21  ;;  %v45_v24 = vsel %vm41_vm1, %v39_v19, 0.0  ;;  %v47_v25 = vsel %vm41_vm1, %v40_v20, 0.0  ;;  %p98_p2 = scmp.lt.s32.totalorder %s96_s4, %s92_s30 }
   0xc   :  { %v46_v26 = vadd.f32 %v45_v24, %v44_v23  ;;  %p99_p3 = por %p98_p2, %p97_p1 }
   0xe   :  { %v48_v27 = vadd.f32 %v47_v25, %v46_v26  ;;  %p100_p4 = pnand %p99_p3, %p93_p0 }
  0x10   :  { %v49_v28 = vrot.slane %v48_v27, 4 }
  0x12   :  { %v50_v29 = vadd.f32 %v49_v28, %v48_v27 }
  0x14   :  { %v51_v30 = vrot.slane %v50_v29, 2 }
  0x16   :  { %v52_v31 = vadd.f32 %v51_v30, %v50_v29 }
  0x18   :  { %v53_v32 = vrot.slane %v52_v31, 1 }
  0x1a   :  { %v54_v33 = vadd.f32 %v53_v32, %v52_v31 }
  0x1c   :  { %90 = vrsqrt.f32 %v54_v33  ;;  %vm57_vm2 = vcmp.eq.f32.partialorder %v54_v33, inf  ;;  %v60_v35 = vand.u32 2147483648, %v54_v33  ;;  %vm59_vm3 = vcmp.eq.f32.partialorder %v54_v33, 0.0 }
  0x1d   :  { %v66_v43 = vmul.f32 %v65_v41, %v54_v33 }
  0x26   :  { %v91_v34 = vpop.eup %90 }
  0x27   :  { %v56_v36 = vmul.f32 %v91_v34, %v54_v33 }
  0x29   :  { %v58_v38 = vsel %vm57_vm2, %v54_v33, %v56_v36 }
  0x2a   :  { %v61_v39 = vsel %vm59_vm3, %v60_v35, %v58_v38 }
  0x2b   :  { %v63_v40 = vsub.f32 1.0, %v61_v39 }
  0x2d   :  { %v64_v42 = vmax.f32 %v63_v40, 0.0 }
  0x2f   :  { %v67_v44 = vmul.f32 %v64_v42, %v62_v37 }
  0x31   :  { %v68_v45 = vmul.f32 %v67_v44, %v64_v42 }
  0x33   :  { %v69_v47 = vadd.f32 %v68_v45, %v66_v43 }
  0x35   :  { %v71_v48 = vadd.f32 %v70_v46, %v69_v47 }
  0x37   :  { %73 = vst.msk [vmem:[#allocation2] sm:$0x1] %vm19_vm0, %v71_v48 }
  0x38   :  { %103 = shalt.err (!%p100_p4)
}
  0x39   :  { %s104_s6 = scalar_lea.hbm %s182_s3, 16 }
  0x3a   :  { %p105_p5 = scmp.ne.s32.totalorder %s182_s3, %s104_s6  ;;  %p108_p6 = scmp.lt.u32.totalorder %s104_s6, %s182_s3 }
  0x3c   :  { %p110_p7 = pnand %p108_p6, %p105_p5 }
  0x3e   :  { %113 = shalt.err (!%p110_p7)
}
  0x3f   :  { %83 = dma.vmem_to_hbm [thread:$0]  %s81_s29, 16, %s182_s3, [#allocation3]  }
  0x40   :  { %114 = dma.done.wait [#allocation3], 16  }
  0x41   :  { %115 = vsyncadd [#allocation3], 4294967280 }
  0x42   :  { %87 = vsyncpa [#allocation3], 1 }

</bundles_post_ra>
